<compile_context>
chip_gen: v6e
topology: v6e:2x2x1
jax: 0.10.0
libtpu: 0.0.40
codegen_flags: <defaults>
</compile_context>

<pallas_src>
import functools

import jax
import jax.numpy as jnp
from jax.experimental import pallas as pl
from jax.experimental.pallas import tpu as pltpu

KSIZE = 4
PAD = 1
EPS = 1e-5
NEG_SLOPE = 0.2


def _block_kernel(p_ref, w_ref, o_ref, sum_sc, ssq_sc, *, hw_tile, n_tiles):
    """One (batch, hw-tile) grid step.

    p_ref : (Kp, hw_tile) bf16   im2col patches tile (HW on lanes)
    w_ref : (Cout, Kp)    bf16   reordered conv weight
    o_ref : (Cout, HW)           output block, resident across the hw-tile axis
    sum_sc, ssq_sc : (Cout, 1) f32 scratch -- per-channel running sum / sum-of-squares
    """
    t = pl.program_id(1)

    @pl.when(t == 0)
    def _init():
        sum_sc[...] = jnp.zeros_like(sum_sc)
        ssq_sc[...] = jnp.zeros_like(ssq_sc)

    # Conv tile on the MXU: bf16 operands, f32 accumulation.
    conv = jnp.dot(w_ref[...], p_ref[...], preferred_element_type=jnp.float32)

    # Per-channel stats (cross-lane reductions -> XLU slot; accumulators stay f32).
    sum_sc[...] += jnp.sum(conv, axis=1, keepdims=True)
    ssq_sc[...] += jnp.sum(conv * conv, axis=1, keepdims=True)

    # Park the raw conv tile in the resident output block.
    if n_tiles == 1:
        o_ref[...] = conv.astype(o_ref.dtype)
    else:
        col = pl.multiple_of(t * hw_tile, hw_tile)
        o_ref[:, pl.ds(col, hw_tile)] = conv.astype(o_ref.dtype)

    @pl.when(t == n_tiles - 1)
    def _finalize():
        hw_total = o_ref.shape[1]          # static
        inv_hw = 1.0 / float(hw_total)
        mean = sum_sc[...] * inv_hw                         # (Cout, 1)
        var = ssq_sc[...] * inv_hw - mean * mean            # biased variance
        inv_std = jax.lax.rsqrt(var + EPS)                  # EUP
        shift = mean * inv_std
        # Fused scale-and-shift, then LeakyReLU(0.2), one pass over (Cout, HW).
        y = o_ref[...].astype(jnp.float32) * inv_std - shift
        y = jnp.where(y >= 0, y, NEG_SLOPE * y)
        o_ref[...] = y.astype(o_ref.dtype)


def _im2col_T(x_nchw, stride, compute_dtype):
    """Reflect-pad and extract 4x4 taps as (N, Cin*16, HWout), tap-major K ordering."""
    n, c, h, w = x_nchw.shape
    xp = jnp.pad(x_nchw.astype(compute_dtype),
                 ((0, 0), (0, 0), (PAD, PAD), (PAD, PAD)), mode="reflect")
    h_out = (h + 2 * PAD - KSIZE) // stride + 1
    w_out = (w + 2 * PAD - KSIZE) // stride + 1

    taps = []
    for kh in range(KSIZE):
        for kw in range(KSIZE):
            tap = xp[:, :,
                     kh:kh + stride * (h_out - 1) + 1:stride,
                     kw:kw + stride * (w_out - 1) + 1:stride]   # (N, Cin, Hout, Wout)
            taps.append(tap.reshape(n, c, h_out * w_out))
    # K index = (kh*4 + kw)*Cin + ci  -> matches weight.transpose(0, 2, 3, 1)
    patches = jnp.concatenate(taps, axis=1)                      # (N, 16*Cin, HW)
    return patches, h_out, w_out


def _pick_hw_tile(hw, k_pad):
    """Largest multiple-of-128 divisor of hw under a ~8 MiB bf16 patches-tile budget."""
    if hw % 128 != 0:
        return hw                      # small / odd spatial sizes: whole-extent block
    budget = 8 * 1024 * 1024           # bytes per (double-buffered) bf16 patches buffer
    target = max(128, min(hw, (budget // (2 * k_pad)) // 128 * 128))
    for cand in range(target, 127, -128):
        if hw % cand == 0:
            return cand
    return hw


@functools.partial(jax.jit, static_argnames=("stride", "out_dtype"))
def block_forward(x_nchw, weight, bias=None, *, stride, out_dtype=jnp.float32):
    """Forward pass of `Block`.

    x_nchw : (N, Cin, H, W); weight : (Cout, Cin, 4, 4); bias : (Cout,) or None.
    `bias` is accepted for API parity but unused: with InstanceNorm2d(affine=False)
    the per-channel mean subtraction cancels a per-channel conv bias exactly.
    """
    del bias
    n, c_in, _, _ = x_nchw.shape
    c_out = weight.shape[0]

    patches, h_out, w_out = _im2col_T(x_nchw, stride, jnp.bfloat16)
    hw = h_out * w_out
    k = c_in * KSIZE * KSIZE

    # Weight in tap-major K layout, bf16 for the MXU.
    w_mat = weight.astype(jnp.bfloat16).transpose(0, 2, 3, 1).reshape(c_out, k)

    # Pad K up to a multiple of 128 (MXU depth).  No-op when Cin % 8 == 0; for tiny Cin
    # it trades a bit of extra (zero) patch traffic for full systolic-array cadence.
    k_pad = ((k + 127) // 128) * 128
    if k_pad != k:
        patches = jnp.pad(patches, ((0, 0), (0, k_pad - k), (0, 0)))
        w_mat = jnp.pad(w_mat, ((0, 0), (0, k_pad - k)))

    hw_tile = _pick_hw_tile(hw, k_pad)
    n_tiles = hw // hw_tile

    kernel = functools.partial(_block_kernel, hw_tile=hw_tile, n_tiles=n_tiles)

    out = pl.pallas_call(
        kernel,
        out_shape=jax.ShapeDtypeStruct((n, c_out, hw), out_dtype),
        grid_spec=pltpu.PrefetchScalarGridSpec(
            num_scalar_prefetch=0,
            grid=(n, n_tiles),
            in_specs=[
                pl.BlockSpec((None, k_pad, hw_tile), lambda b, t: (b, 0, t)),
                pl.BlockSpec((c_out, k_pad), lambda b, t: (0, 0)),
            ],
            out_specs=pl.BlockSpec((None, c_out, hw), lambda b, t: (b, 0, 0)),
            scratch_shapes=[
                pltpu.VMEM((c_out, 1), jnp.float32),   # per-channel sum
                pltpu.VMEM((c_out, 1), jnp.float32),   # per-channel sum of squares
            ],
        ),
        compiler_params=pltpu.CompilerParams(
            dimension_semantics=("parallel", "arbitrary"),
            vmem_limit_bytes=48 * 1024 * 1024,
        ),
    )(patches, w_mat)

    # (N, Cout, HW) -> (N, Cout, Hout, Wout): pure reshape, no transpose.
    return out.reshape(n, c_out, h_out, w_out)


def _reference(x_nchw, weight, bias, stride):
    """Pure-JAX f32 reference matching the PyTorch module (bias included)."""
    xp = jnp.pad(x_nchw, ((0, 0), (0, 0), (PAD, PAD), (PAD, PAD)), mode="reflect")
    conv = jax.lax.conv_general_dilated(
        xp.astype(jnp.float32), weight.astype(jnp.float32),
        window_strides=(stride, stride), padding="VALID",
        dimension_numbers=("NCHW", "OIHW", "NCHW"),
    ) + bias.reshape(1, -1, 1, 1)
    mean = jnp.mean(conv, axis=(2, 3), keepdims=True)
    var = jnp.mean((conv - mean) ** 2, axis=(2, 3), keepdims=True)
    y = (conv - mean) * jax.lax.rsqrt(var + EPS)
    return jnp.where(y >= 0, y, NEG_SLOPE * y)


if __name__ == "__main__":
    def run_case(key, n, c_in, c_out, h, w, stride):
        kx, kw_, kb = jax.random.split(key, 3)
        x = jax.random.normal(kx, (n, c_in, h, w), dtype=jnp.float32)
        fan_in = c_in * KSIZE * KSIZE
        bound = 1.0 / (fan_in ** 0.5)
        weight = jax.random.uniform(kw_, (c_out, c_in, KSIZE, KSIZE),
                                    minval=-bound, maxval=bound, dtype=jnp.float32)
        bias = jax.random.uniform(kb, (c_out,), minval=-bound, maxval=bound,
                                  dtype=jnp.float32)

        out = jax.block_until_ready(block_forward(x, weight, bias, stride=stride))
        ref = _reference(x, weight, bias, stride)
        assert out.shape == ref.shape, (out.shape, ref.shape)
        # bf16 MXU operands vs. a full-f32 reference -> tolerance a bit above bf16 eps.
        err = float(jnp.max(jnp.abs(out - ref)))
        assert jnp.allclose(out, ref, rtol=2e-2, atol=2e-2), err

    key = jax.random.PRNGKey(0)
    k1, k2 = jax.random.split(key)
    run_case(k1, n=2, c_in=4, c_out=8, h=16, w=16, stride=2)   # downsampling block
    run_case(k2, n=1, c_in=3, c_out=8, h=16, w=16, stride=1)   # stride-1 / K-padding path

    print("KERNEL_OK")
</pallas_src>

<mosaic_0001>
module attributes {stable_mosaic.version = 11 : i64} {
  func.func @_block_kernel(%arg0: i32, %arg1: i32, %arg2: memref<1x128x64xbf16, #tpu.memory_space<vmem>>, %arg3: memref<8x128xbf16, #tpu.memory_space<vmem>>, %arg4: memref<1x8x64xf32, #tpu.memory_space<vmem>>, %arg5: memref<8x1xf32, #tpu.memory_space<vmem>>, %arg6: memref<8x1xf32, #tpu.memory_space<vmem>>) attributes {dimension_semantics = [#tpu.dimension_semantics<parallel>, #tpu.dimension_semantics<arbitrary>], iteration_bounds = array<i64: 2, 1>, scalar_prefetch = 0 : i64, scratch_operands = 2 : i64, tpu.core_type = #tpu.core_type<tc>, window_params = [{transform_indices = @transform_0, window_bounds = array<i64: 1, 128, 64>}, {pipeline_mode = #tpu.pipeline_mode<synchronous>, transform_indices = @transform_1, window_bounds = array<i64: 8, 128>}, {transform_indices = @transform_2, window_bounds = array<i64: 1, 8, 64>}]} {
    %c0_i32 = arith.constant 0 : i32
    %0 = arith.cmpi eq, %arg1, %c0_i32 : i32
    %1 = arith.extui %0 : i1 to i32
    %c0_i32_0 = arith.constant 0 : i32
    %2 = arith.cmpi ne, %1, %c0_i32_0 : i32
    scf.if %2 {
      %cst_20 = arith.constant 0.000000e+00 : f32
      %24 = vector.broadcast %cst_20 : f32 to vector<8x1xf32>
      %c0_21 = arith.constant 0 : index
      %c0_22 = arith.constant 0 : index
      %25 = vector.load %arg5[%c0_21, %c0_22] : memref<8x1xf32, #tpu.memory_space<vmem>>, vector<8x1xf32>
      tpu.vector_store %arg5[%c0_21, %c0_22], %24 {strides = array<i32>} : memref<8x1xf32, #tpu.memory_space<vmem>>, vector<8x1xf32>,
      %cst_23 = arith.constant 0.000000e+00 : f32
      %26 = vector.broadcast %cst_23 : f32 to vector<8x1xf32>
      %c0_24 = arith.constant 0 : index
      %c0_25 = arith.constant 0 : index
      %27 = vector.load %arg6[%c0_24, %c0_25] : memref<8x1xf32, #tpu.memory_space<vmem>>, vector<8x1xf32>
      tpu.vector_store %arg6[%c0_24, %c0_25], %26 {strides = array<i32>} : memref<8x1xf32, #tpu.memory_space<vmem>>, vector<8x1xf32>,
    } else {
    }
    %c0 = arith.constant 0 : index
    %c0_1 = arith.constant 0 : index
    %3 = vector.load %arg3[%c0, %c0_1] : memref<8x128xbf16, #tpu.memory_space<vmem>>, vector<8x128xbf16>
    %c0_2 = arith.constant 0 : index
    %c0_3 = arith.constant 0 : index
    %c0_4 = arith.constant 0 : index
    %4 = vector.load %arg2[%c0_2, %c0_3, %c0_4] : memref<1x128x64xbf16, #tpu.memory_space<vmem>>, vector<1x128x64xbf16>
    %5 = vector.shape_cast %4 : vector<1x128x64xbf16> to vector<128x64xbf16>
    %cst = arith.constant dense<0.000000e+00> : vector<8x64xf32>
    %6 = tpu.matmul %3, %5, %cst {dimension_numbers = #tpu.dot_dimension_numbers<[1], [0], [0], [1], [0, 0, 1, 1], [], []>} : vector<8x128xbf16>, vector<128x64xbf16>, vector<8x64xf32> -> vector<8x64xf32>
    %c0_5 = arith.constant 0 : index
    %c0_6 = arith.constant 0 : index
    %7 = vector.load %arg5[%c0_5, %c0_6] : memref<8x1xf32, #tpu.memory_space<vmem>>, vector<8x1xf32>
    %cst_7 = arith.constant dense<0.000000e+00> : vector<8xf32>
    %8 = vector.multi_reduction <add>, %6, %cst_7 [1] : vector<8x64xf32> to vector<8xf32>
    %9 = vector.shape_cast %8 : vector<8xf32> to vector<8x1xf32>
    %10 = arith.addf %7, %9 : vector<8x1xf32>
    %c0_8 = arith.constant 0 : index
    %c0_9 = arith.constant 0 : index
    %11 = vector.load %arg5[%c0_8, %c0_9] : memref<8x1xf32, #tpu.memory_space<vmem>>, vector<8x1xf32>
    tpu.vector_store %arg5[%c0_8, %c0_9], %10 {strides = array<i32>} : memref<8x1xf32, #tpu.memory_space<vmem>>, vector<8x1xf32>,
    %c0_10 = arith.constant 0 : index
    %c0_11 = arith.constant 0 : index
    %12 = vector.load %arg6[%c0_10, %c0_11] : memref<8x1xf32, #tpu.memory_space<vmem>>, vector<8x1xf32>
    %13 = arith.mulf %6, %6 : vector<8x64xf32>
    %cst_12 = arith.constant dense<0.000000e+00> : vector<8xf32>
    %14 = vector.multi_reduction <add>, %13, %cst_12 [1] : vector<8x64xf32> to vector<8xf32>
    %15 = vector.shape_cast %14 : vector<8xf32> to vector<8x1xf32>
    %16 = arith.addf %12, %15 : vector<8x1xf32>
    %c0_13 = arith.constant 0 : index
    %c0_14 = arith.constant 0 : index
    %17 = vector.load %arg6[%c0_13, %c0_14] : memref<8x1xf32, #tpu.memory_space<vmem>>, vector<8x1xf32>
    tpu.vector_store %arg6[%c0_13, %c0_14], %16 {strides = array<i32>} : memref<8x1xf32, #tpu.memory_space<vmem>>, vector<8x1xf32>,
    %c0_15 = arith.constant 0 : index
    %c0_16 = arith.constant 0 : index
    %c0_17 = arith.constant 0 : index
    %18 = vector.load %arg4[%c0_15, %c0_16, %c0_17] : memref<1x8x64xf32, #tpu.memory_space<vmem>>, vector<1x8x64xf32>
    %19 = vector.shape_cast %18 : vector<1x8x64xf32> to vector<8x64xf32>
    %20 = vector.shape_cast %6 : vector<8x64xf32> to vector<1x8x64xf32>
    tpu.vector_store %arg4[%c0_15, %c0_16, %c0_17], %20 {strides = array<i32>} : memref<1x8x64xf32, #tpu.memory_space<vmem>>, vector<1x8x64xf32>,
    %c0_i32_18 = arith.constant 0 : i32
    %21 = arith.cmpi eq, %arg1, %c0_i32_18 : i32
    %22 = arith.extui %21 : i1 to i32
    %c0_i32_19 = arith.constant 0 : i32
    %23 = arith.cmpi ne, %22, %c0_i32_19 : i32
    scf.if %23 {
      %c0_20 = arith.constant 0 : index
      %c0_21 = arith.constant 0 : index
      %24 = vector.load %arg5[%c0_20, %c0_21] : memref<8x1xf32, #tpu.memory_space<vmem>>, vector<8x1xf32>
      %cst_22 = arith.constant 1.562500e-02 : f32
      %25 = vector.broadcast %cst_22 : f32 to vector<8x1xf32>
      %26 = arith.mulf %24, %25 : vector<8x1xf32>
      %c0_23 = arith.constant 0 : index
      %c0_24 = arith.constant 0 : index
      %27 = vector.load %arg6[%c0_23, %c0_24] : memref<8x1xf32, #tpu.memory_space<vmem>>, vector<8x1xf32>
      %cst_25 = arith.constant 1.562500e-02 : f32
      %28 = vector.broadcast %cst_25 : f32 to vector<8x1xf32>
      %29 = arith.mulf %27, %28 : vector<8x1xf32>
      %30 = arith.mulf %26, %26 : vector<8x1xf32>
      %31 = arith.subf %29, %30 : vector<8x1xf32>
      %cst_26 = arith.constant 9.99999974E-6 : f32
      %32 = vector.broadcast %cst_26 : f32 to vector<8x1xf32>
      %33 = arith.addf %31, %32 : vector<8x1xf32>
      %34 = math.rsqrt %33 : vector<8x1xf32>
      %35 = arith.mulf %26, %34 : vector<8x1xf32>
      %c0_27 = arith.constant 0 : index
      %c0_28 = arith.constant 0 : index
      %c0_29 = arith.constant 0 : index
      %36 = vector.load %arg4[%c0_27, %c0_28, %c0_29] : memref<1x8x64xf32, #tpu.memory_space<vmem>>, vector<1x8x64xf32>
      %37 = vector.shape_cast %36 : vector<1x8x64xf32> to vector<8x64xf32>
      %38 = vector.broadcast %34 : vector<8x1xf32> to vector<8x64xf32>
      %39 = arith.mulf %37, %38 : vector<8x64xf32>
      %40 = vector.broadcast %35 : vector<8x1xf32> to vector<8x64xf32>
      %41 = arith.subf %39, %40 : vector<8x64xf32>
      %cst_30 = arith.constant 0.000000e+00 : f32
      %42 = vector.broadcast %cst_30 : f32 to vector<8x64xf32>
      %43 = arith.cmpf oge, %41, %42 : vector<8x64xf32>
      %cst_31 = arith.constant 2.000000e-01 : f32
      %44 = vector.broadcast %cst_31 : f32 to vector<8x64xf32>
      %45 = arith.mulf %44, %41 : vector<8x64xf32>
      %46 = arith.select %43, %41, %45 : vector<8x64xi1>, vector<8x64xf32>
      %c0_32 = arith.constant 0 : index
      %c0_33 = arith.constant 0 : index
      %c0_34 = arith.constant 0 : index
      %47 = vector.load %arg4[%c0_32, %c0_33, %c0_34] : memref<1x8x64xf32, #tpu.memory_space<vmem>>, vector<1x8x64xf32>
      %48 = vector.shape_cast %47 : vector<1x8x64xf32> to vector<8x64xf32>
      %49 = vector.shape_cast %46 : vector<8x64xf32> to vector<1x8x64xf32>
      tpu.vector_store %arg4[%c0_32, %c0_33, %c0_34], %49 {strides = array<i32>} : memref<1x8x64xf32, #tpu.memory_space<vmem>>, vector<1x8x64xf32>,
    } else {
    }
    return
  }
  func.func @transform_0(%arg0: i32, %arg1: i32) -> (i32, i32, i32) {
    %c0_i32 = arith.constant 0 : i32
    %c0_i32_0 = arith.constant 0 : i32
    return %arg0, %c0_i32, %arg1 : i32, i32, i32
  }
  func.func @transform_1(%arg0: i32, %arg1: i32) -> (i32, i32) {
    %c0_i32 = arith.constant 0 : i32
    %c0_i32_0 = arith.constant 0 : i32
    %c0_i32_1 = arith.constant 0 : i32
    return %c0_i32, %c0_i32_0 : i32, i32
  }
  func.func @transform_2(%arg0: i32, %arg1: i32) -> (i32, i32, i32) {
    %c0_i32 = arith.constant 0 : i32
    %c0_i32_0 = arith.constant 0 : i32
    %c0_i32_1 = arith.constant 0 : i32
    return %arg0, %c0_i32, %c0_i32_0 : i32, i32, i32
  }
}

</mosaic_0001>

<bundles_post_ra>
// kernel: block_forward.1
= control target key start
LH: loop header
LB: loop body
LE: loop exit
PB: predicated region body
PF: predicated region fallthrough
CT: control target
= control target key end

     0   :  { %s519_s9 = smov 0   ;;  %s521_s10 = smov 0   ;;  %s572_s0 = inlined_call_operand.vmem [shape: bf16[2,128,64], index: 0, kind: input, shape index: {}]   ;;  %s573_s1 = inlined_call_operand.vmem [shape: bf16[8,128], index: 1, kind: input, shape index: {}]   ;;  %s574_s2 = inlined_call_operand.vmem [shape: f32[2,8,64], index: 2, kind: output, shape index: {}]  }
   0x1   :  { %s523_s11 = smov 0  }
   0x2 LB: > { %s24_s12 = sadd.s32 1, %s495_s10  ;;  %p394_p0 = scmp.ge.s32.totalorder %s499_s11, 1  ;;  %s499_s11 = sphi %s523_s11, %s12_s11   ;;  %s495_s10 = sphi %s521_s10, %s576_s10   ;;  %s491_s9 = sphi %s519_s9, %s575_s9  }
   0x3   : > { %p26_p1 = scmp.ge.s32.totalorder %s24_s12, 2  ;;  %p129_p2 = scmp.lt.s32.totalorder %s499_s11, 3 }
   0x5   : > { %s578_s12 = smov (%p26_p1, %s24_s12), 0  ;;  %p130_p3 = pnand %p394_p0, %p129_p2 }
   0x6   : > { %p153_p4 = scmp.lt.s32.totalorder (!%p130_p3), %s491_s9, 1 }
   0x7   : > { %133 = sbr.rel (%p130_p3) target bundleno = 547 (0x223), region = 28 }
   0xc   : > { %v501_v0 = vmov 0.0   ;;  %vm502_vm0 = vmmov 0   ;;  %s580_s9 = smov (!%p153_p4, %s491_s9), 1  ;;  %v173_v9 = vld [vmem:[%s573_s1] sm:$0xf]  ;;  %vm170_vm1 = vcmask 7168  }
   0xd   : > { %418 = vmatprep.subr.bf16.mxu0 %v501_v0  ;;  %434 = vmatprep.mubr.msk.bf16.mxu0 %vm502_vm0, %v501_v0  ;;  %s408_s13 = sshll.u32 %s580_s9, 6  ;;  %171 = vst.msk [vmem:[#allocation2] sm:$0xff] %vm170_vm1, %v501_v0  ;;  %172 = vst.msk [vmem:[#allocation3] sm:$0xff] %vm170_vm1, %v501_v0  ;;  %s397_s19 = sshll.u32 %s580_s9, 3  ;;  %vm279_vm2 = vcmask 523264   ;;  %v503_v17 = vmov 0  }
   0xe   : > { %s160_s16 = scalar_lea.vmem %s572_s0, %s408_s13  ;;  %s552_s22 = scalar_lea.vmem %s574_s2, %s397_s19  ;;  %465 = vset.pattern.permute.xlu1 %v503_v17  ;;  %466 = vset.pattern.permute.xlu0 %v503_v17 }
   0xf   : > { %v467_v1 = vld [vmem:[%s160_s16 + $0x38] sm:$0xff]   ;;  %v468_v2 = vld [vmem:[%s160_s16 + $0x30] sm:$0xff]   ;;  %v469_v3 = vld [vmem:[%s160_s16 + $0x28] sm:$0xff]  }
  0x10   : > { %419 = vmatpush3.bf16.msra.mxu0 %v467_v1  ;;  %v470_v4 = vld [vmem:[%s160_s16 + $0x20] sm:$0xff]   ;;  %v471_v5 = vld [vmem:[%s160_s16 + $0x18] sm:$0xff]   ;;  %v472_v6 = vld [vmem:[%s160_s16 + $0x10] sm:$0xff]  }
  0x11   : > { %420 = vmatprep.subr.bf16.mxu0 %v501_v0  ;;  %v473_v7 = vld [vmem:[%s160_s16 + $0x8] sm:$0xff]   ;;  %v474_v8 = vld [vmem:[%s160_s16] sm:$0xff]  }
  0x14   : > { %421 = vmatpush3.bf16.msra.mxu0 %v468_v2  ;;  %v278_v18 = vld [vmem:[#allocation2] sm:$0xff]  ;;  %v286_v21 = vld [vmem:[#allocation3] sm:$0xff] }
  0x15   : > { %422 = vmatprep.subr.bf16.mxu0 %v501_v0 }
  0x18   : > { %423 = vmatpush3.bf16.msra.mxu0 %v469_v3 }
  0x19   : > { %424 = vmatprep.subr.bf16.mxu0 %v501_v0 }
  0x1c   : > { %425 = vmatpush3.bf16.msra.mxu0 %v470_v4 }
  0x1d   : > { %426 = vmatprep.subr.bf16.mxu0 %v501_v0 }
  0x20   : > { %427 = vmatpush3.bf16.msra.mxu0 %v471_v5 }
  0x21   : > { %428 = vmatprep.subr.bf16.mxu0 %v501_v0 }
  0x24   : > { %429 = vmatpush3.bf16.msra.mxu0 %v472_v6 }
  0x25   : > { %430 = vmatprep.subr.bf16.mxu0 %v501_v0 }
  0x28   : > { %431 = vmatpush3.bf16.msra.mxu0 %v473_v7 }
  0x29   : > { %432 = vmatprep.subr.bf16.mxu0 %v501_v0 }
  0x2c   : > { %433 = vmatpush3.bf16.msra.mxu0 %v474_v8 }
  0x2f   : > { %435 = vmatmul.mubr.bf16.vlgmr.msra.gmra.mxu0 %v173_v9 }
  0xef   : > { %v272_v10 = vpop.f32.mrf.mxu0 }
  0xf0   : > { %293 = vst.msk [vmem:[%s552_s22] sm:$0xff] %vm279_vm2, %v272_v10  ;;  %v280_v11 = vsel %vm279_vm2, %v272_v10, 0.0  ;;  %v287_v12 = vmul.f32 %v272_v10, %v272_v10 }
  0xf1   : > { %281 = vadd.xlane.f32.xlu0 %v280_v11  ;;  %v436_v13 = vpop.f32.mrf.mxu0 }
  0xf2   : > { %v288_v15 = vsel %vm279_vm2, %v287_v12, 0.0 }
  0xf3   : > { %v275_v14 = vpop.f32.mrf.mxu0 }
  0xf5   : > { %289 = vadd.xlane.f32.xlu0 %v288_v15  ;;  %v437_v16 = vpop.f32.mrf.mxu0 }
  0xf7   : > { %v306_v34 = vld [vmem:[%s552_s22] sm:$0xff] }
 0x17a   : > { %v282_v19 = vpop.xlane.xlu0 %281 }
 0x17b   : > { %v283_v20 = vadd.f32 %v282_v19, %v278_v18 }
 0x17d   : > { %285 = vst.msk [vmem:[#allocation2] sm:$0xff] %vm170_vm1, %v283_v20 }
 0x17e   : > { %v290_v22 = vpop.xlane.xlu0 %289 }
 0x17f   : > { %v291_v23 = vadd.f32 %v290_v22, %v286_v21 }
 0x181   : > { %292 = vst.msk [vmem:[#allocation3] sm:$0xff] %vm170_vm1, %v291_v23 }
 0x184   : > { %v297_v24 = vld [vmem:[#allocation2] sm:$0xff] }
 0x185   : > { %v298_v25 = vmul.f32 0.015625, %v297_v24 }
 0x187   : > { %v301_v28 = vmul.f32 %v298_v25, %v298_v25 }
 0x188   : > { %v299_v26 = vld [vmem:[#allocation3] sm:$0xff] }
 0x189   : > { %v300_v27 = vmul.f32 0.015625, %v299_v26 }
 0x18b   : > { %v302_v29 = vsub.f32 %v300_v27, %v301_v28 }
 0x18d   : > { %v303_v30 = vadd.f32 1e-05, %v302_v29 }
 0x18f   : > { %475 = vrsqrt.f32 %v303_v30 }
 0x19c   : > { %v476_v31 = vpop.eup %475 }
 0x19d   : > { %309 = vperm.xlu1 %465, %v476_v31   ;;  %v305_v32 = vmul.f32 %v476_v31, %v298_v25 }
 0x1a1   : > { %315 = vperm.xlu1 %465, %v305_v32  }
 0x218   : > { %v310_v33 = vpop.permute.xlu1 %309 }
 0x219   : > { %v312_v35 = vmul.f32 %v310_v33, %v306_v34 }
 0x21c   : > { %v316_v36 = vpop.permute.xlu1 %315 }
 0x21d   : > { %v318_v37 = vsub.f32 %v312_v35, %v316_v36 }
 0x21f   : > { %vm319_vm3 = vcmp.ge.f32.partialorder %v318_v37, 0.0  ;;  %v320_v38 = vmul.f32 0.2, %v318_v37 }
 0x221   : > { %v321_v39 = vsel %vm319_vm3, %v318_v37, %v320_v38 }
 0x222   : > { %322 = vst.msk [vmem:[%s552_s22] sm:$0xff] %vm279_vm2, %v321_v39 }
 0x223 PF: > { %s12_s11 = sadd.s32 1, %s499_s11   ;;  %s575_s9 = smov %s495_s10 }
 0x224   : > { %p9_p5 = scmp.ge.s32.totalorder %s12_s11, 4   ;;  %s576_s10 = smov %s578_s12 }
 0x226   :  { %11 = sbr.rel (!%p9_p5) target bundleno = 2 (0x2), region = 66 }

</bundles_post_ra>
